<compile_context>
chip_gen: v6e
topology: v6e:2x2x1
jax: 0.10.0
libtpu: 0.0.40
codegen_flags: <defaults>
</compile_context>

<pallas_src>
import jax
import jax.numpy as jnp
from jax.experimental import pallas as pl
from jax.experimental.pallas import tpu as pltpu

NUM_CLASSES = 23

_LANES = 128
_SUBLANES = 8
_SINGLE_BLOCK_MAX_BYTES = 4 * 1024 * 1024   # whole-array-in-VMEM only below this
_TILE_TARGET_BYTES = 2 * 1024 * 1024        # ~2 MiB per block on the tiled path


def _identity_copy_kernel(a_ref, o_ref):
    # TODO(synk): the PyTorch forward never applies alexNet (or any layer) to
    # the input; it just returns the attribute, so a faithful port is a pure
    # identity materialization of that stored tensor.
    o_ref[...] = a_ref[...]


def _pallas_identity(a,
                     single_block_max_bytes=_SINGLE_BLOCK_MAX_BYTES,
                     tile_target_bytes=_TILE_TARGET_BYTES):
    """Materialize `a` via a lane-dense, sublane-aligned Pallas identity copy."""
    orig_shape = a.shape
    orig_dtype = a.dtype
    total = a.size
    itemsize = jnp.dtype(orig_dtype).itemsize

    # ---- Build a lane-dense (rows, 128) slab, rows a multiple of 8 ---------
    rows = pl.cdiv(total, _LANES)
    rows = ((rows + _SUBLANES - 1) // _SUBLANES) * _SUBLANES  # sublane-align

    slab_bytes = rows * _LANES * itemsize
    use_single_block = slab_bytes <= single_block_max_bytes

    if use_single_block:
        r_tile = rows
        grid = None
    else:
        # ~2 MiB blocks, sublane-aligned row count per block.
        r_tile = max(
            _SUBLANES,
            (tile_target_bytes // (_LANES * itemsize)) // _SUBLANES * _SUBLANES,
        )
        rows = ((rows + r_tile - 1) // r_tile) * r_tile  # pad to whole blocks
        grid = (rows // r_tile,)

    padded_total = rows * _LANES
    flat = a.reshape(-1)
    if padded_total != total:
        flat = jnp.pad(flat, (0, padded_total - total))
    a2d = flat.reshape(rows, _LANES)

    cost = pl.CostEstimate(
        flops=0, transcendentals=0, bytes_accessed=2 * padded_total * itemsize
    )

    if grid is None:
        # Tiny case: one VMEM-resident block, no grid, no per-step pipeline
        # overhead; output aliases the input slab in HBM.
        out2d = pl.pallas_call(
            _identity_copy_kernel,
            out_shape=jax.ShapeDtypeStruct(a2d.shape, a2d.dtype),
            in_specs=[pl.BlockSpec(memory_space=pltpu.MemorySpace.VMEM)],
            out_specs=pl.BlockSpec(memory_space=pltpu.MemorySpace.VMEM),
            input_output_aliases={0: 0},
            cost_estimate=cost,
        )(a2d)
    else:
        # Large case: DMA-bound tiled copy; ~2 MiB blocks keep the footprint
        # (in + out, double-buffered) well under every generation's VMEM, and
        # "parallel" lets v7x shard the row axis across both TensorCores.
        out2d = pl.pallas_call(
            _identity_copy_kernel,
            out_shape=jax.ShapeDtypeStruct(a2d.shape, a2d.dtype),
            grid=grid,
            in_specs=[pl.BlockSpec((r_tile, _LANES), lambda i: (i, 0))],
            out_specs=pl.BlockSpec((r_tile, _LANES), lambda i: (i, 0)),
            input_output_aliases={0: 0},
            cost_estimate=cost,
            compiler_params=pltpu.CompilerParams(
                dimension_semantics=("parallel",)
            ),
        )(a2d)

    out_flat = out2d.reshape(-1)
    if padded_total != total:
        out_flat = out_flat[:total]
    return out_flat.reshape(orig_shape)


class SegmentationNN:
    """JAX/Pallas port of exercise_10 SegmentationNN (alexnet variant)."""

    def __init__(self, num_classes=NUM_CLASSES, hp=None, alexNet=None):
        self.hp = hp or {}
        self.num_classes = num_classes
        self.padding = self.hp.get("padding", 1)
        self.stride_down = self.hp.get("stride_down", 2)
        self.stride_up = self.hp.get("stride_up", 2)
        # Stored exactly like the PyTorch module stores `alexNet`.
        self.alexNet = alexNet

    def __call__(self, x):
        return self.forward(x)

    def forward(self, x):
        # Reference semantics: return self.alexNet, input `x` is unused.
        del x
        return _pallas_identity(self.alexNet)


if __name__ == "__main__":
    key = jax.random.PRNGKey(0)
    k_x, k_a = jax.random.split(key)

    # Input in NCHW as the module's conv-style interface implies (batch=2,
    # channels=4, spatial=16). It is ignored by forward, per the reference.
    x = jax.random.normal(k_x, (2, 4, 16, 16), dtype=jnp.float32)

    # Deterministic stand-in for the `alexNet` attribute passed to __init__,
    # shaped like a segmentation output [N, num_classes, H, W].
    alexnet_attr = jax.random.normal(
        k_a, (2, NUM_CLASSES, 16, 16), dtype=jnp.float32
    )

    hp = {"padding": 1, "stride_down": 2, "stride_up": 2}
    model = SegmentationNN(num_classes=NUM_CLASSES, hp=hp, alexNet=alexnet_attr)

    out = model(x)
    out = jax.block_until_ready(out)

    assert out.shape == alexnet_attr.shape and out.dtype == alexnet_attr.dtype
    assert bool(jnp.allclose(out, alexnet_attr))

    # Sanity-check the tiled (grid + "parallel") path on the same small tensor
    # by forcing tiny per-block byte budgets; values must be identical.
    out_tiled = _pallas_identity(
        alexnet_attr, single_block_max_bytes=0, tile_target_bytes=8 * 128 * 4
    )
    out_tiled = jax.block_until_ready(out_tiled)
    assert bool(jnp.allclose(out_tiled, alexnet_attr))

    print("KERNEL_OK")
</pallas_src>

<mosaic_0001>
module attributes {stable_mosaic.version = 11 : i64} {
  func.func @_identity_copy_kernel(%arg0: memref<96x128xf32, #tpu.memory_space<vmem>>, %arg1: memref<96x128xf32, #tpu.memory_space<vmem>>) attributes {dimension_semantics = [], scalar_prefetch = 0 : i64, scratch_operands = 0 : i64, tpu.core_type = #tpu.core_type<tc>} {
    %c0 = arith.constant 0 : index
    %c0_0 = arith.constant 0 : index
    %0 = vector.load %arg0[%c0, %c0_0] : memref<96x128xf32, #tpu.memory_space<vmem>>, vector<96x128xf32>
    %c0_1 = arith.constant 0 : index
    %c0_2 = arith.constant 0 : index
    %1 = vector.load %arg1[%c0_1, %c0_2] : memref<96x128xf32, #tpu.memory_space<vmem>>, vector<96x128xf32>
    tpu.vector_store %arg1[%c0_1, %c0_2], %0 {strides = array<i32>} : memref<96x128xf32, #tpu.memory_space<vmem>>, vector<96x128xf32>,
    return
  }
}

</mosaic_0001>

<bundles_post_ra>
// kernel: tpu_custom_call.1
= control target key start
LH: loop header
LB: loop body
LE: loop exit
PB: predicated region body
PF: predicated region fallthrough
CT: control target
= control target key end

     0   :  { %6 = vsyncpa [#allocation3], 0  ;;  %s138_s0 = inlined_call_operand.hbm [shape: f32[96,128], index: 0, kind: input, shape index: {}, may-alias: {0,1}]   ;;  %s139_s1 = inlined_call_operand.hbm [shape: f32[96,128], index: 1, kind: output, shape index: {}, may-alias: {0,1}]  }
   0x1   :  { %7 = vsyncpa [#allocation4], 0  ;;  %s112_s6 = smov [#allocation2]  }
   0x2   :  { %s13_s7 = sshll.u32 %s112_s6, 4  ;;  %s14_s7 = int_to_ptr.vmem [resolvable:$true] %s13_s7 }
   0x3   :  { %s76_s8 = scalar_lea.vmem %s14_s7, 1536  ;;  %p81_p1 = scmp.lt.s32.totalorder %s14_s7, %s14_s7 }
   0x4   :  { %p77_p0 = scmp.ne.s32.totalorder %s14_s7, %s76_s8  ;;  %p82_p2 = scmp.lt.s32.totalorder %s76_s8, %s76_s8 }
   0x6   :  { %p83_p3 = por %p82_p2, %p81_p1 }
   0x8   :  { %p84_p4 = pnand %p83_p3, %p77_p0 }
   0xa   :  { %87 = shalt.err (!%p84_p4)
}
   0xb   :  { %s113_s9 = smov 128   ;;  %s114_s10 = smov 8  }
   0xc   :  { %19 = dma.hbm_to_vmem [thread:$0]  %s138_s0, 1536, %s14_s7, [#allocation3], %s113_s9, %s113_s9, %s114_s10  }
   0xd   :  { %108 = dma.done.wait [#allocation3], 1536  }
   0xe   :  { %109 = vsyncadd [#allocation3], 4294965760  ;;  %s115_s13 = smov [#allocation5]   ;;  %v23_v0 = vld [vmem:[#allocation2] sm:$0xff]  ;;  %v24_v1 = vld [vmem:[#allocation2 + $0x8] sm:$0xff] }
   0xf   :  { %s52_s14 = sshll.u32 %s115_s13, 4  ;;  %v25_v2 = vld [vmem:[#allocation2 + $0x10] sm:$0xff]  ;;  %35 = vst [vmem:[#allocation5] sm:$0xff] %v23_v0  ;;  %36 = vst [vmem:[#allocation5 + $0x8] sm:$0xff] %v24_v1  ;;  %v26_v3 = vld [vmem:[#allocation2 + $0x18] sm:$0xff]  ;;  %s53_s14 = int_to_ptr.vmem [resolvable:$true] %s52_s14 }
  0x10   :  { %37 = vst [vmem:[#allocation5 + $0x10] sm:$0xff] %v25_v2  ;;  %v27_v4 = vld [vmem:[#allocation2 + $0x20] sm:$0xff]  ;;  %v28_v5 = vld [vmem:[#allocation2 + $0x28] sm:$0xff]  ;;  %38 = vst [vmem:[#allocation5 + $0x18] sm:$0xff] %v26_v3  ;;  %s88_s0 = scalar_lea.vmem %s53_s14, 1536  ;;  %p93_p6 = scmp.lt.s32.totalorder %s53_s14, %s53_s14 }
  0x11   :  { %39 = vst [vmem:[#allocation5 + $0x20] sm:$0xff] %v27_v4  ;;  %40 = vst [vmem:[#allocation5 + $0x28] sm:$0xff] %v28_v5  ;;  %v29_v6 = vld [vmem:[#allocation2 + $0x30] sm:$0xff]  ;;  %v30_v7 = vld [vmem:[#allocation2 + $0x38] sm:$0xff]  ;;  %p89_p5 = scmp.ne.s32.totalorder %s53_s14, %s88_s0  ;;  %p94_p7 = scmp.lt.s32.totalorder %s88_s0, %s88_s0 }
  0x12   :  { %v31_v8 = vld [vmem:[#allocation2 + $0x40] sm:$0xff]  ;;  %41 = vst [vmem:[#allocation5 + $0x30] sm:$0xff] %v29_v6  ;;  %42 = vst [vmem:[#allocation5 + $0x38] sm:$0xff] %v30_v7  ;;  %v32_v9 = vld [vmem:[#allocation2 + $0x48] sm:$0xff] }
  0x13   :  { %43 = vst [vmem:[#allocation5 + $0x40] sm:$0xff] %v31_v8  ;;  %v33_v10 = vld [vmem:[#allocation2 + $0x50] sm:$0xff]  ;;  %v34_v11 = vld [vmem:[#allocation2 + $0x58] sm:$0xff]  ;;  %44 = vst [vmem:[#allocation5 + $0x48] sm:$0xff] %v32_v9  ;;  %p95_p8 = por %p94_p7, %p93_p6 }
  0x14   :  { %45 = vst [vmem:[#allocation5 + $0x50] sm:$0xff] %v33_v10  ;;  %46 = vst [vmem:[#allocation5 + $0x58] sm:$0xff] %v34_v11 }
  0x15   :  { %p96_p9 = pnand %p95_p8, %p89_p5 }
  0x17   :  { %99 = shalt.err (!%p96_p9)
}
  0x18   :  { %58 = dma.vmem_to_hbm [thread:$0]  %s53_s14, 1536, %s139_s1, [#allocation4], %s113_s9, %s113_s9, %s114_s10  }
  0x19   :  { %110 = dma.done.wait [#allocation4], 1536  }
  0x1a   :  { %111 = vsyncadd [#allocation4], 4294965760 }
  0x1b   :  { %62 = vsyncpa [#allocation3], 1 }
  0x1c   :  { %63 = vsyncpa [#allocation4], 1 }

</bundles_post_ra>
